<compile_context>
chip_gen: v7x
topology: tpu7x:2x2x1
jax: 0.10.0
libtpu: 0.0.40
codegen_flags: <defaults>
</compile_context>

<pallas_src>
import functools

import jax
import jax.numpy as jnp
from jax.experimental import pallas as pl
from jax.experimental.pallas import tpu as pltpu

EPS = 1e-5
_ROW_CHUNK = 256  # sublane chunk for in-kernel passes (multiple of 8)


def _batchnorm_kernel(x_ref, gamma_ref, beta_ref, o_ref, *, nc):
    # x_ref: (N, TF) in VMEM; gamma/beta: (1, TF); o_ref: (N, TF).
    n, tf = x_ref.shape
    num_full = n // nc
    rem = n - num_full * nc
    unroll = num_full <= 8
    inv_n = jnp.float32(1.0 / n)

    def load(start, size):
        return x_ref[pl.ds(start, size), :].astype(jnp.float32)

    # ---- pass 1: per-feature mean (f32 accumulation, chunked over sublanes) ----
    s1 = jnp.zeros((1, tf), jnp.float32)
    if num_full:
        def body1(i, acc):
            start = pl.multiple_of(i * nc, nc)
            return acc + jnp.sum(load(start, nc), axis=0, keepdims=True)
        s1 = jax.lax.fori_loop(0, num_full, body1, s1, unroll=unroll)
    if rem:
        s1 = s1 + jnp.sum(load(num_full * nc, rem), axis=0, keepdims=True)
    mean = s1 * inv_n                                    # (1, TF)

    # ---- pass 2: centered sum of squares (no E[x^2]-E[x]^2 cancellation) ----
    s2 = jnp.zeros((1, tf), jnp.float32)
    if num_full:
        def body2(i, acc):
            start = pl.multiple_of(i * nc, nc)
            d = load(start, nc) - mean
            return acc + jnp.sum(d * d, axis=0, keepdims=True)
        s2 = jax.lax.fori_loop(0, num_full, body2, s2, unroll=unroll)
    if rem:
        d = load(num_full * nc, rem) - mean
        s2 = s2 + jnp.sum(d * d, axis=0, keepdims=True)
    var = s2 * inv_n                                     # biased variance
    inv_std = jax.lax.rsqrt(var + EPS)                   # (1, TF), EUP

    # ---- fold per-feature scalars; wide apply pass is mul + add only ----
    scale = gamma_ref[...].astype(jnp.float32) * inv_std  # (1, TF)
    shift = beta_ref[...].astype(jnp.float32) - mean * scale

    # ---- pass 3: apply (chunked; stores straight to o_ref, no full-tile temp) ----
    def apply(start, size):
        o_ref[pl.ds(start, size), :] = (
            load(start, size) * scale + shift).astype(o_ref.dtype)

    if num_full:
        def body3(i, carry):
            start = pl.multiple_of(i * nc, nc)
            apply(start, nc)
            return carry
        jax.lax.fori_loop(0, num_full, body3, 0, unroll=unroll)
    if rem:
        apply(num_full * nc, rem)


def _vmem_budget_bytes():
    """(vmem_limit_bytes, pipelined_buffer_budget_bytes) per TPU generation."""
    cap = None
    try:
        cap = getattr(pltpu.get_tpu_info(), "vmem_capacity_bytes", None)
    except Exception:
        cap = None
    if cap is None:
        cap = 64 * 1024 * 1024          # conservative fallback (v7x per-TC size)
    if cap >= 96 * 1024 * 1024:          # v5e / v6e: 128 MiB physical VMEM
        return 100 * 1024 * 1024, 40 * 1024 * 1024
    else:                                # v7x: 64 MiB per TensorCore
        return 48 * 1024 * 1024, 24 * 1024 * 1024


def batch_norm(x: jax.Array, gamma: jax.Array, beta: jax.Array) -> jax.Array:
    """Training-mode BatchNorm1d forward for x of shape (N, F)."""
    n, f = x.shape
    itemsize = x.dtype.itemsize
    f128 = pl.cdiv(f, 128) * 128

    vmem_limit, buffer_budget = _vmem_budget_bytes()

    # Whole batch must fit one feature-column block (4 pipelined buffers at
    # the minimum 128-lane tile).  TODO(synk): N-tiled two-phase reduction grid.
    if 4 * n * 128 * itemsize > buffer_budget:
        raise NotImplementedError(
            "batch dimension too large for single-block batch statistics; "
            "an N-tiled reduction path is not implemented")

    # ---- Feature-tile sizing: byte-based, balanced, lane-dense ----
    # 4 pipelined x-sized buffers (2 in + 2 out); cap lanes at 8192 so the
    # per-feature f32 rows (mean/scale/shift) stay a few vregs wide.
    per_buf = buffer_budget // 4
    tf_cap = (per_buf // (n * itemsize)) // 128 * 128
    tf_cap = max(128, min(tf_cap, 8192))

    num_tiles = pl.cdiv(f128, tf_cap)
    if f128 >= 256:
        num_tiles = max(num_tiles, 2)      # give both v7x TensorCores work
    tf = pl.cdiv(pl.cdiv(f128, num_tiles), 128) * 128   # balanced, mult of 128
    grid_f = pl.cdiv(f, tf)                # actual number of feature tiles
    fp = grid_f * tf                       # padded extent for gamma/beta only

    # x / out are NOT padded: edge feature block is a masked DMA window and the
    # garbage lanes only affect columns whose output writes are masked anyway.
    gamma2d = gamma.reshape(1, f)
    beta2d = beta.reshape(1, f)
    if fp != f:  # tiny (1, F) copies only
        gamma2d = jnp.pad(gamma2d, ((0, 0), (0, fp - f)), constant_values=1.0)
        beta2d = jnp.pad(beta2d, ((0, 0), (0, fp - f)))

    kernel = functools.partial(_batchnorm_kernel, nc=_ROW_CHUNK)

    out = pl.pallas_call(
        kernel,
        out_shape=jax.ShapeDtypeStruct((n, f), x.dtype),
        grid=(grid_f,),
        in_specs=[
            pl.BlockSpec((n, tf), lambda j: (0, j)),
            pl.BlockSpec((1, tf), lambda j: (0, j)),
            pl.BlockSpec((1, tf), lambda j: (0, j)),
        ],
        out_specs=pl.BlockSpec((n, tf), lambda j: (0, j)),
        compiler_params=pltpu.CompilerParams(
            dimension_semantics=("parallel",),
            vmem_limit_bytes=vmem_limit,
        ),
        cost_estimate=pl.CostEstimate(
            flops=7 * n * f,
            transcendentals=f,
            bytes_accessed=2 * n * f * itemsize + 2 * f * 4,
        ),
        # NOTE: pipeline_mode=pl.Buffered(3) on the x input is a cheap knob to
        # sweep once shapes are fixed; left at the default depth of 2 here.
    )(x, gamma2d, beta2d)

    return out


def _reference_batch_norm(x, gamma, beta):
    xf = x.astype(jnp.float32)
    mean = jnp.mean(xf, axis=0, keepdims=True)
    var = jnp.mean((xf - mean) ** 2, axis=0, keepdims=True)
    y = (xf - mean) / jnp.sqrt(var + EPS) * gamma.reshape(1, -1) + beta.reshape(1, -1)
    return y.astype(x.dtype)


if __name__ == "__main__":
    key = jax.random.PRNGKey(0)
    batch, num_features = 8, 32   # F intentionally not a multiple of 128:
                                  # exercises the masked edge-block path.

    x = jax.random.normal(key, (batch, num_features), dtype=jnp.float32) * 2.0 + 0.5
    # Deterministic parameter init (torch.nn.BatchNorm1d defaults, affine=True):
    gamma = jnp.ones((num_features,), dtype=jnp.float32)   # weight
    beta = jnp.zeros((num_features,), dtype=jnp.float32)   # bias

    out = batch_norm(x, gamma, beta)
    jax.block_until_ready(out)

    ref = _reference_batch_norm(x, gamma, beta)
    assert out.shape == x.shape and out.dtype == x.dtype
    assert jnp.allclose(out, ref, atol=1e-5, rtol=1e-5)

    print("KERNEL_OK")
</pallas_src>

<mosaic_0001>
module attributes {stable_mosaic.version = 11 : i64} {
  func.func @_batchnorm_kernel(%arg0: i32, %arg1: memref<8x128xf32, #tpu.memory_space<vmem>>, %arg2: memref<1x128xf32, #tpu.memory_space<vmem>>, %arg3: memref<1x128xf32, #tpu.memory_space<vmem>>, %arg4: memref<8x128xf32, #tpu.memory_space<vmem>>) attributes {dimension_semantics = [#tpu.dimension_semantics<parallel>], iteration_bounds = array<i64: 1>, scalar_prefetch = 0 : i64, scratch_operands = 0 : i64, tpu.core_type = #tpu.core_type<tc>, window_params = [{transform_indices = @transform_0, window_bounds = array<i64: 8, 128>}, {transform_indices = @transform_1, window_bounds = array<i64: 1, 128>}, {transform_indices = @transform_2, window_bounds = array<i64: 1, 128>}, {transform_indices = @transform_3, window_bounds = array<i64: 8, 128>}]} {
    %cst = arith.constant 0.000000e+00 : f32
    %0 = vector.broadcast %cst : f32 to vector<1x128xf32>
    %c0 = arith.constant 0 : index
    %c0_0 = arith.constant 0 : index
    %1 = vector.load %arg1[%c0, %c0_0] : memref<8x128xf32, #tpu.memory_space<vmem>>, vector<8x128xf32>
    %cst_1 = arith.constant dense<0.000000e+00> : vector<128xf32>
    %2 = vector.multi_reduction <add>, %1, %cst_1 [0] : vector<8x128xf32> to vector<128xf32>
    %3 = vector.shape_cast %2 : vector<128xf32> to vector<1x128xf32>
    %4 = arith.addf %0, %3 : vector<1x128xf32>
    %cst_2 = arith.constant 1.250000e-01 : f32
    %5 = vector.broadcast %cst_2 : f32 to vector<1x128xf32>
    %6 = arith.mulf %4, %5 : vector<1x128xf32>
    %cst_3 = arith.constant 0.000000e+00 : f32
    %7 = vector.broadcast %cst_3 : f32 to vector<1x128xf32>
    %c0_4 = arith.constant 0 : index
    %c0_5 = arith.constant 0 : index
    %8 = vector.load %arg1[%c0_4, %c0_5] : memref<8x128xf32, #tpu.memory_space<vmem>>, vector<8x128xf32>
    %9 = vector.broadcast %6 : vector<1x128xf32> to vector<8x128xf32>
    %10 = arith.subf %8, %9 : vector<8x128xf32>
    %11 = arith.mulf %10, %10 : vector<8x128xf32>
    %cst_6 = arith.constant dense<0.000000e+00> : vector<128xf32>
    %12 = vector.multi_reduction <add>, %11, %cst_6 [0] : vector<8x128xf32> to vector<128xf32>
    %13 = vector.shape_cast %12 : vector<128xf32> to vector<1x128xf32>
    %14 = arith.addf %7, %13 : vector<1x128xf32>
    %cst_7 = arith.constant 1.250000e-01 : f32
    %15 = vector.broadcast %cst_7 : f32 to vector<1x128xf32>
    %16 = arith.mulf %14, %15 : vector<1x128xf32>
    %cst_8 = arith.constant 9.99999974E-6 : f32
    %17 = vector.broadcast %cst_8 : f32 to vector<1x128xf32>
    %18 = arith.addf %16, %17 : vector<1x128xf32>
    %19 = math.rsqrt %18 : vector<1x128xf32>
    %c0_9 = arith.constant 0 : index
    %c0_10 = arith.constant 0 : index
    %20 = vector.load %arg2[%c0_9, %c0_10] : memref<1x128xf32, #tpu.memory_space<vmem>>, vector<1x128xf32>
    %21 = arith.mulf %20, %19 : vector<1x128xf32>
    %c0_11 = arith.constant 0 : index
    %c0_12 = arith.constant 0 : index
    %22 = vector.load %arg3[%c0_11, %c0_12] : memref<1x128xf32, #tpu.memory_space<vmem>>, vector<1x128xf32>
    %23 = arith.mulf %6, %21 : vector<1x128xf32>
    %24 = arith.subf %22, %23 : vector<1x128xf32>
    %c0_13 = arith.constant 0 : index
    %c0_14 = arith.constant 0 : index
    %25 = vector.load %arg1[%c0_13, %c0_14] : memref<8x128xf32, #tpu.memory_space<vmem>>, vector<8x128xf32>
    %26 = vector.broadcast %21 : vector<1x128xf32> to vector<8x128xf32>
    %27 = arith.mulf %25, %26 : vector<8x128xf32>
    %28 = vector.broadcast %24 : vector<1x128xf32> to vector<8x128xf32>
    %29 = arith.addf %27, %28 : vector<8x128xf32>
    %c0_15 = arith.constant 0 : index
    %c0_16 = arith.constant 0 : index
    %30 = vector.load %arg4[%c0_15, %c0_16] : memref<8x128xf32, #tpu.memory_space<vmem>>, vector<8x128xf32>
    tpu.vector_store %arg4[%c0_15, %c0_16], %29 {strides = array<i32>} : memref<8x128xf32, #tpu.memory_space<vmem>>, vector<8x128xf32>,
    return
  }
  func.func @transform_0(%arg0: i32) -> (i32, i32) {
    %c0_i32 = arith.constant 0 : i32
    %c0_i32_0 = arith.constant 0 : i32
    return %c0_i32, %arg0 : i32, i32
  }
  func.func @transform_1(%arg0: i32) -> (i32, i32) {
    %c0_i32 = arith.constant 0 : i32
    %c0_i32_0 = arith.constant 0 : i32
    return %c0_i32, %arg0 : i32, i32
  }
  func.func @transform_2(%arg0: i32) -> (i32, i32) {
    %c0_i32 = arith.constant 0 : i32
    %c0_i32_0 = arith.constant 0 : i32
    return %c0_i32, %arg0 : i32, i32
  }
  func.func @transform_3(%arg0: i32) -> (i32, i32) {
    %c0_i32 = arith.constant 0 : i32
    %c0_i32_0 = arith.constant 0 : i32
    return %c0_i32, %arg0 : i32, i32
  }
}

</mosaic_0001>

<bundles_post_ra>
// kernel: tpu_custom_call.1
= control target key start
LH: loop header
LB: loop body
LE: loop exit
PB: predicated region body
PF: predicated region fallthrough
CT: control target
= control target key end

     0   :  { %8 = vsyncpa [#allocation3], 0  ;;  %s187_s0 = inlined_call_operand.hbm [shape: f32[8,32], index: 0, kind: input, shape index: {}]   ;;  %s188_s1 = inlined_call_operand.vmem [shape: f32[1,128], index: 1, kind: input, shape index: {}]   ;;  %s189_s2 = inlined_call_operand.vmem [shape: f32[1,128], index: 2, kind: input, shape index: {}]   ;;  %s190_s3 = inlined_call_operand.hbm [shape: f32[8,32], index: 3, kind: output, shape index: {}]  }
   0x1   :  { %9 = vsyncpa [#allocation4], 0  ;;  %s135_s12 = smov [#allocation2]   ;;  %s87_s16 = scalar_lea.hbm %s187_s0, 128 }
   0x2   :  { %s16_s13 = sshll.u32 %s135_s12, 4  ;;  %p88_p0 = scmp.ne.s32.totalorder %s187_s0, %s87_s16  ;;  %s17_s13 = int_to_ptr.vmem [resolvable:$true] %s16_s13 }
   0x3   :  { %p91_p1 = scmp.lt.u32.totalorder %s87_s16, %s187_s0 }
   0x5   :  { %p93_p2 = pnand %p91_p1, %p88_p0 }
   0x7   :  { %96 = shalt.err (!%p93_p2)
}
   0x8   :  { %s97_s21 = scalar_lea.vmem %s17_s13, 128  ;;  %p102_p4 = scmp.lt.s32.totalorder %s17_s13, %s17_s13 }
   0x9   :  { %p98_p3 = scmp.ne.s32.totalorder %s17_s13, %s97_s21  ;;  %p103_p5 = scmp.lt.s32.totalorder %s97_s21, %s97_s21 }
   0xb   :  { %p104_p6 = por %p103_p5, %p102_p4 }
   0xd   :  { %p105_p7 = pnand %p104_p6, %p98_p3 }
   0xf   :  { %108 = shalt.err (!%p105_p7)
}
  0x10   :  { %19 = dma.hbm_to_vmem [thread:$0]  %s187_s0, 128, %s17_s13, [#allocation3]  }
  0x11   :  { %131 = dma.done.wait [#allocation3], 128  }
  0x12   :  { %132 = vsyncadd [#allocation3], 4294967168  ;;  %v27_v0 = vld [vmem:[#allocation2] sm:$0xff]  ;;  %v54_v18 = vlaneseq  ;;  %s136_s27 = smov [#allocation5]  }
  0x13   :  { %v28_v1 = vrot.slane %v27_v0, 4  ;;  %v48_v20 = vld [vmem:[%s188_s1] sm:$0x1]  ;;  %s74_s28 = sshll.u32 %s136_s27, 4  ;;  %s75_s28 = int_to_ptr.vmem [resolvable:$true] %s74_s28 }
  0x14   :  { %v55_v19 = vshrl.u32 %v54_v18, 7  ;;  %v50_v24 = vld [vmem:[%s189_s2] sm:$0x1]  ;;  %s109_s29 = scalar_lea.vmem %s75_s28, 128  ;;  %p114_p9 = scmp.lt.s32.totalorder %s75_s28, %s75_s28 }
  0x15   :  { %v29_v2 = vadd.f32 %v28_v1, %v27_v0  ;;  %p110_p8 = scmp.ne.s32.totalorder %s75_s28, %s109_s29  ;;  %p115_p10 = scmp.lt.s32.totalorder %s109_s29, %s109_s29 }
  0x16   :  { %v56_v21 = vsub.s32 0, %v55_v19 }
  0x17   :  { %v30_v3 = vrot.slane %v29_v2, 2  ;;  %p116_p11 = por %p115_p10, %p114_p9 }
  0x19   :  { %v31_v4 = vadd.f32 %v30_v3, %v29_v2  ;;  %p117_p12 = pnand %p116_p11, %p110_p8 }
  0x1b   :  { %v32_v5 = vrot.slane %v31_v4, 1 }
  0x1d   :  { %v33_v6 = vadd.f32 %v32_v5, %v31_v4 }
  0x1f   :  { %v35_v7 = vmul.f32 0.125, %v33_v6 }
  0x21   :  { %v36_v8 = vsub.f32 %v27_v0, %v35_v7 }
  0x23   :  { %v37_v9 = vmul.f32 %v36_v8, %v36_v8 }
  0x25   :  { %v38_v10 = vrot.slane %v37_v9, 4 }
  0x27   :  { %v39_v11 = vadd.f32 %v38_v10, %v37_v9 }
  0x29   :  { %v40_v12 = vrot.slane %v39_v11, 2 }
  0x2b   :  { %v41_v13 = vadd.f32 %v40_v12, %v39_v11 }
  0x2d   :  { %v42_v14 = vrot.slane %v41_v13, 1 }
  0x2f   :  { %v43_v15 = vadd.f32 %v42_v14, %v41_v13 }
  0x31   :  { %v45_v16 = vmul.f32 0.125, %v43_v15 }
  0x33   :  { %v46_v17 = vadd.f32 1e-05, %v45_v16 }
  0x35   :  { %85 = vrsqrt.f32 %v46_v17 }
  0x3f   :  { %v86_v22 = vpop.eup %85 }
  0x40   :  { %v49_v23 = vmul.f32 %v86_v22, %v48_v20 }
  0x42   :  { %v51_v25 = vmul.f32 %v49_v23, %v35_v7  ;;  %v57_v26 = vrot.slane %v49_v23, %v56_v21 }
  0x44   :  { %v52_v27 = vsub.f32 %v50_v24, %v51_v25  ;;  %v59_v28 = vmul.f32 %v57_v26, %v27_v0 }
  0x46   :  { %v64_v29 = vrot.slane %v52_v27, %v56_v21 }
  0x48   :  { %v66_v30 = vadd.f32 %v64_v29, %v59_v28 }
  0x4a   :  { %67 = vst [vmem:[#allocation5] sm:$0xff] %v66_v30 }
  0x4b   :  { %120 = shalt.err (!%p117_p12)
}
  0x4c   :  { %s121_s2 = scalar_lea.hbm %s190_s3, 128 }
  0x4d   :  { %p122_p13 = scmp.ne.s32.totalorder %s190_s3, %s121_s2  ;;  %p125_p0 = scmp.lt.u32.totalorder %s121_s2, %s190_s3 }
  0x4f   :  { %p127_p1 = pnand %p125_p0, %p122_p13 }
  0x51   :  { %130 = shalt.err (!%p127_p1)
}
  0x52   :  { %77 = dma.vmem_to_hbm [thread:$0]  %s75_s28, 128, %s190_s3, [#allocation4]  }
  0x53   :  { %133 = dma.done.wait [#allocation4], 128  }
  0x54   :  { %134 = vsyncadd [#allocation4], 4294967168 }
  0x55   :  { %81 = vsyncpa [#allocation3], 1 }
  0x56   :  { %82 = vsyncpa [#allocation4], 1 }

</bundles_post_ra>
